<compile_context>
chip_gen: v7x
topology: tpu7x:2x2x1
jax: 0.10.0
libtpu: 0.0.40
codegen_flags: <defaults>
</compile_context>

<pallas_src>
import jax
import jax.numpy as jnp
from jax.experimental import pallas as pl
from jax.experimental.pallas import tpu as pltpu


def wide_deep_attention_kernel(
    x_fbe_ref,    # (F, B, E)   embeddings, feature-major (for batched attention)
    x_flat_ref,   # (B, F*E)    embeddings, flattened batch-major (for residual/DNN)
    dense_ref,    # (B, Nd)     dense indices cast to float (wide branch input)
    wqkv_ref, bqkv_ref,    # (E, 3E), (1, 3E)   fused in_proj  [q | k | v]
    wo_ref, bo_ref,        # (E, E),  (1, E)    MHA out_proj
    wwide_ref, bwide_ref,  # (1, Nd), (1, 1)    wide Linear (weight pre-transposed)
    w1_ref, b1_ref,        # (F*E, H1), (1, H1)
    w2_ref, b2_ref,        # (H1, H2),  (1, H2)
    wf_ref, bf_ref,        # (H2, 1),   (1, 1)
    out_ref,               # (B, 1)
):
    x3 = x_fbe_ref[...]                       # (F, B, E)
    F, B, E = x3.shape
    scale = 1.0 / (float(E) ** 0.5)

    # ---- attention, batched over the F feature columns ----
    # (PyTorch quirk preserved: MHA fed (B,F,E) with default (L,N,E) layout, so the
    #  softmax mixes over the batch axis independently per feature column.)
    x2 = x3.reshape(F * B, E)                 # leading-dim merge, layout-free
    qkv = jnp.dot(x2, wqkv_ref[...], preferred_element_type=jnp.float32) + bqkv_ref[...]
    q = qkv[:, 0 * E:1 * E].reshape(F, B, E)
    k = qkv[:, 1 * E:2 * E].reshape(F, B, E)
    v = qkv[:, 2 * E:3 * E].reshape(F, B, E)

    s = jnp.einsum('fqe,fke->fqk', q, k, preferred_element_type=jnp.float32) * scale
    s = s - jnp.max(s, axis=-1, keepdims=True)
    p = jnp.exp(s)
    p = p * pl.reciprocal(jnp.sum(p, axis=-1, keepdims=True), approx=True)
    o = jnp.einsum('fqk,fke->fqe', p, v, preferred_element_type=jnp.float32)   # (F,B,E)

    # out_proj applied to all F*B rows in one matmul
    op = jnp.dot(o.reshape(F * B, E), wo_ref[...],
                 preferred_element_type=jnp.float32) + bo_ref[...]             # (F*B, E)
    op = op.reshape(F, B, E)

    # ---- DNN layer 1 with the residual folded in ----
    #   dnn_in = flatten(x + attn)  =>  h1_pre = x_flat @ W1 + attn @ W1 + b1
    # The f-major attention output is contracted against W1 reshaped (F, E, H1), which
    # removes the concat / transpose relayout entirely (pure batched matmul + adds).
    w1 = w1_ref[...]
    H1 = w1.shape[1]
    w1r = w1.reshape(F, E, H1)
    attn_h = jnp.einsum('fbe,feh->fbh', op, w1r, preferred_element_type=jnp.float32)
    h = (jnp.dot(x_flat_ref[...], w1, preferred_element_type=jnp.float32)
         + jnp.sum(attn_h, axis=0) + b1_ref[...])
    h = jnp.maximum(h, 0.0)

    # remaining DNN layers (dropout p=0.0 is identity)
    h = jnp.maximum(
        jnp.dot(h, w2_ref[...], preferred_element_type=jnp.float32) + b2_ref[...], 0.0)
    deep = jnp.dot(h, wf_ref[...], preferred_element_type=jnp.float32) + bf_ref[...]   # (B,1)

    # ---- wide branch on the VPU (a K=2, N=1 MXU matmul would be pure padding) ----
    wide = jnp.sum(dense_ref[...] * wwide_ref[...], axis=-1, keepdims=True) + bwide_ref[...]

    logits = 0.5 * (wide + deep)
    out_ref[...] = 1.0 / (1.0 + jnp.exp(-logits))                                       # sigmoid


def prepare_kernel_params(params):
    """One-time host-side weight prep: fuse QKV, pre-transpose the wide weight."""
    (wq, wk, wv, bq, bk, bv, wo, bo, wwide, bwide, w1, b1, w2, b2, wf, bf) = params
    wqkv = jnp.concatenate([wq, wk, wv], axis=1)      # (E, 3E)
    bqkv = jnp.concatenate([bq, bk, bv], axis=1)      # (1, 3E)
    wwide_t = wwide.T                                  # (1, Nd)  -> VPU broadcast-mul
    return (wqkv, bqkv, wo, bo, wwide_t, bwide, w1, b1, w2, b2, wf, bf)


def wide_deep_attention(input_embeds, dense_f, kernel_params):
    """Single-invocation (no grid) Pallas call; the whole problem lives in VMEM."""
    B, F, E = input_embeds.shape
    # layout plumbing outside the kernel: feature-major view for attention,
    # flattened batch-major view for the residual / DNN input.
    x_fbe = jnp.transpose(input_embeds, (1, 0, 2))     # (F, B, E)
    x_flat = input_embeds.reshape(B, F * E)            # (B, F*E)
    args = (x_fbe, x_flat, dense_f) + tuple(kernel_params)
    out = pl.pallas_call(
        wide_deep_attention_kernel,
        out_shape=jax.ShapeDtypeStruct((B, 1), jnp.float32),
        in_specs=[pl.BlockSpec(memory_space=pltpu.MemorySpace.VMEM) for _ in args],
        out_specs=pl.BlockSpec(memory_space=pltpu.MemorySpace.VMEM),
    )(*args)
    return out.reshape(B)


def _reference(input_embeds, dense_f, params):
    """Pure-JAX reference mirroring the PyTorch forward (sanity check)."""
    (wq, wk, wv, bq, bk, bv, wo, bo, wwide, bwide, w1, b1, w2, b2, wf, bf) = params
    B, F, E = input_embeds.shape
    scale = 1.0 / (float(E) ** 0.5)
    cols = []
    for f in range(F):
        xf = input_embeds[:, f, :]
        q = xf @ wq + bq
        k = xf @ wk + bk
        v = xf @ wv + bv
        p = jax.nn.softmax((q @ k.T) * scale, axis=-1)
        o = (p @ v) @ wo + bo
        cols.append(xf + o)
    dnn_in = jnp.concatenate(cols, axis=-1)
    h = jnp.maximum(dnn_in @ w1 + b1, 0.0)
    h = jnp.maximum(h @ w2 + b2, 0.0)
    deep = h @ wf + bf
    wide = dense_f @ wwide + bwide
    return jax.nn.sigmoid(0.5 * (wide + deep)).reshape(B)


if __name__ == "__main__":
    # --- problem configuration (small, consistent with the module) ---
    B = 8                     # batch
    n_dense, n_sparse = 2, 3  # dense / sparse feature columns
    E = 16                    # embedding_dim (== sparse embed_dim, required by hstack+MHA)
    F = n_dense + n_sparse    # total feature slots
    hidden_units = [64, 32]   # Dnn hidden widths; hidden_units.insert(0, F*E) -> [80, 64, 32]
    dense_vocab = 1000        # synthetic stand-in for the 10_000_000-row dense embedding
    sparse_vocabs = [50, 30, 20]

    key = jax.random.PRNGKey(0)
    keys = jax.random.split(key, 20)

    # --- deterministic parameter init (shapes follow the module's __init__) ---
    dense_table = jax.random.normal(keys[0], (dense_vocab, E), jnp.float32) * 0.05
    sparse_tables = [
        jax.random.normal(keys[1 + i], (sparse_vocabs[i], E), jnp.float32) * 0.05
        for i in range(n_sparse)
    ]

    def lin(k, fan_in, fan_out, scale=0.05):
        kw, kb = jax.random.split(k)
        w = jax.random.normal(kw, (fan_in, fan_out), jnp.float32) * scale   # pre-transposed
        b = jax.random.normal(kb, (1, fan_out), jnp.float32) * scale
        return w, b

    kidx = 1 + n_sparse
    wq, bq = lin(keys[kidx + 0], E, E)          # MHA in_proj (q / k / v blocks)
    wk, bk = lin(keys[kidx + 1], E, E)
    wv, bv = lin(keys[kidx + 2], E, E)
    wo, bo = lin(keys[kidx + 3], E, E)          # MHA out_proj
    wwide, bwide = lin(keys[kidx + 4], n_dense, 1)          # wide Linear(n_dense, 1)
    dnn_dims = [F * E] + hidden_units                        # [80, 64, 32]
    w1, b1 = lin(keys[kidx + 5], dnn_dims[0], dnn_dims[1])
    w2, b2 = lin(keys[kidx + 6], dnn_dims[1], dnn_dims[2])
    wf, bf = lin(keys[kidx + 7], dnn_dims[2], 1)             # Dnn final_linear
    params = (wq, wk, wv, bq, bk, bv, wo, bo, wwide, bwide, w1, b1, w2, b2, wf, bf)
    kernel_params = prepare_kernel_params(params)            # one-time fusion / transpose

    # --- deterministic example input (integer-valued, as the module .long()-casts it) ---
    kd, ks = jax.random.split(keys[19])
    dense_idx = jax.random.randint(kd, (B, n_dense), 0, dense_vocab)
    sparse_idx = jnp.stack(
        [jax.random.randint(jax.random.fold_in(ks, i), (B,), 0, sparse_vocabs[i])
         for i in range(n_sparse)], axis=1)
    x = jnp.concatenate([dense_idx, sparse_idx], axis=1).astype(jnp.float32)  # (B, F)

    # --- glue (plain JAX): slicing + embedding gathers, exactly as the module does ---
    # TODO(synk): the nn.Embedding index gathers stay in host JAX (data-dependent HBM
    # gather; not worth a manual Pallas DMA gather at these table/batch sizes).
    dense_input = x[:, :n_dense].astype(jnp.int32)
    sparse_inputs = x[:, n_dense:].astype(jnp.int32)
    dense_embeds = dense_table[dense_input]                                   # (B, Nd, E)
    sparse_embeds = jnp.stack(
        [sparse_tables[i][sparse_inputs[:, i]] for i in range(n_sparse)], axis=1)  # (B, Ns, E)
    input_embeds = jnp.concatenate([sparse_embeds, dense_embeds], axis=1)     # torch.hstack
    dense_f = dense_input.astype(jnp.float32)                                 # wide branch input

    # --- run kernel ---
    out = wide_deep_attention(input_embeds, dense_f, kernel_params)
    out = jax.block_until_ready(out)
    assert out.shape == (B,)

    # sanity check vs pure-JAX reference (tolerance covers the approx EUP reciprocal
    # in the kernel softmax; everything else is exact f32)
    ref = _reference(input_embeds, dense_f, params)
    assert jnp.allclose(out, ref, atol=1e-3, rtol=1e-3), (out, ref)

    print("KERNEL_OK")
</pallas_src>

<mosaic_0001>
module attributes {stable_mosaic.version = 11 : i64} {
  func.func @wide_deep_attention_kernel(%arg0: memref<5x8x16xf32, #tpu.memory_space<vmem>>, %arg1: memref<8x80xf32, #tpu.memory_space<vmem>>, %arg2: memref<8x2xf32, #tpu.memory_space<vmem>>, %arg3: memref<16x48xf32, #tpu.memory_space<vmem>>, %arg4: memref<1x48xf32, #tpu.memory_space<vmem>>, %arg5: memref<16x16xf32, #tpu.memory_space<vmem>>, %arg6: memref<1x16xf32, #tpu.memory_space<vmem>>, %arg7: memref<1x2xf32, #tpu.memory_space<vmem>>, %arg8: memref<1x1xf32, #tpu.memory_space<vmem>>, %arg9: memref<80x64xf32, #tpu.memory_space<vmem>>, %arg10: memref<1x64xf32, #tpu.memory_space<vmem>>, %arg11: memref<64x32xf32, #tpu.memory_space<vmem>>, %arg12: memref<1x32xf32, #tpu.memory_space<vmem>>, %arg13: memref<32x1xf32, #tpu.memory_space<vmem>>, %arg14: memref<1x1xf32, #tpu.memory_space<vmem>>, %arg15: memref<8x1xf32, #tpu.memory_space<vmem>>) attributes {dimension_semantics = [], scalar_prefetch = 0 : i64, scratch_operands = 0 : i64, tpu.core_type = #tpu.core_type<tc>} {
    %c0 = arith.constant 0 : index
    %c0_0 = arith.constant 0 : index
    %c0_1 = arith.constant 0 : index
    %0 = vector.load %arg0[%c0, %c0_0, %c0_1] : memref<5x8x16xf32, #tpu.memory_space<vmem>>, vector<5x8x16xf32>
    %1 = vector.shape_cast %0 : vector<5x8x16xf32> to vector<40x16xf32>
    %c0_2 = arith.constant 0 : index
    %c0_3 = arith.constant 0 : index
    %2 = vector.load %arg3[%c0_2, %c0_3] : memref<16x48xf32, #tpu.memory_space<vmem>>, vector<16x48xf32>
    %cst = arith.constant dense<0.000000e+00> : vector<40x48xf32>
    %3 = tpu.matmul %1, %2, %cst {dimension_numbers = #tpu.dot_dimension_numbers<[1], [0], [0], [1], [0, 0, 1, 1], [], []>} : vector<40x16xf32>, vector<16x48xf32>, vector<40x48xf32> -> vector<40x48xf32>
    %c0_4 = arith.constant 0 : index
    %c0_5 = arith.constant 0 : index
    %4 = vector.load %arg4[%c0_4, %c0_5] : memref<1x48xf32, #tpu.memory_space<vmem>>, vector<1x48xf32>
    %5 = vector.broadcast %4 : vector<1x48xf32> to vector<40x48xf32>
    %6 = arith.addf %3, %5 : vector<40x48xf32>
    %7 = vector.extract_strided_slice %6 {offsets = [0, 0], sizes = [40, 16], strides = [1, 1]} : vector<40x48xf32> to vector<40x16xf32>
    %8 = vector.shape_cast %7 : vector<40x16xf32> to vector<5x8x16xf32>
    %9 = vector.extract_strided_slice %6 {offsets = [0, 16], sizes = [40, 16], strides = [1, 1]} : vector<40x48xf32> to vector<40x16xf32>
    %10 = vector.shape_cast %9 : vector<40x16xf32> to vector<5x8x16xf32>
    %11 = vector.extract_strided_slice %6 {offsets = [0, 32], sizes = [40, 16], strides = [1, 1]} : vector<40x48xf32> to vector<40x16xf32>
    %12 = vector.shape_cast %11 : vector<40x16xf32> to vector<5x8x16xf32>
    "tpu.trace_start"() <{level = 10 : i32, message = "fqe,fke->fqk"}> : () -> ()
    %cst_6 = arith.constant dense<0.000000e+00> : vector<5x8x8xf32>
    %13 = tpu.matmul %8, %10, %cst_6 {dimension_numbers = #tpu.dot_dimension_numbers<[2], [2], [1], [1], [0, 0, 0, 1, 1, 1], [0], [0]>} : vector<5x8x16xf32>, vector<5x8x16xf32>, vector<5x8x8xf32> -> vector<5x8x8xf32>
    "tpu.trace_stop"() : () -> ()
    %cst_7 = arith.constant 2.500000e-01 : f32
    %14 = vector.broadcast %cst_7 : f32 to vector<5x8x8xf32>
    %15 = arith.mulf %13, %14 : vector<5x8x8xf32>
    %cst_8 = arith.constant dense<0xFF800000> : vector<5x8xf32>
    %16 = vector.multi_reduction <maximumf>, %15, %cst_8 [2] : vector<5x8x8xf32> to vector<5x8xf32>
    %17 = vector.shape_cast %16 : vector<5x8xf32> to vector<5x8x1xf32>
    %18 = vector.broadcast %17 : vector<5x8x1xf32> to vector<5x8x8xf32>
    %19 = arith.subf %15, %18 : vector<5x8x8xf32>
    %20 = math.exp %19 : vector<5x8x8xf32>
    %cst_9 = arith.constant dense<0.000000e+00> : vector<5x8xf32>
    %21 = vector.multi_reduction <add>, %20, %cst_9 [2] : vector<5x8x8xf32> to vector<5x8xf32>
    %22 = vector.shape_cast %21 : vector<5x8xf32> to vector<5x8x1xf32>
    %23 = tpu.reciprocal %22 {approx = true} : vector<5x8x1xf32> -> vector<5x8x1xf32>
    %24 = vector.broadcast %23 : vector<5x8x1xf32> to vector<5x8x8xf32>
    %25 = arith.mulf %20, %24 : vector<5x8x8xf32>
    "tpu.trace_start"() <{level = 10 : i32, message = "fqk,fke->fqe"}> : () -> ()
    %cst_10 = arith.constant dense<0.000000e+00> : vector<5x8x16xf32>
    %26 = tpu.matmul %25, %12, %cst_10 {dimension_numbers = #tpu.dot_dimension_numbers<[2], [1], [1], [2], [0, 0, 0, 1, 1, 2], [0], [0]>} : vector<5x8x8xf32>, vector<5x8x16xf32>, vector<5x8x16xf32> -> vector<5x8x16xf32>
    "tpu.trace_stop"() : () -> ()
    %27 = vector.shape_cast %26 : vector<5x8x16xf32> to vector<40x16xf32>
    %c0_11 = arith.constant 0 : index
    %c0_12 = arith.constant 0 : index
    %28 = vector.load %arg5[%c0_11, %c0_12] : memref<16x16xf32, #tpu.memory_space<vmem>>, vector<16x16xf32>
    %cst_13 = arith.constant dense<0.000000e+00> : vector<40x16xf32>
    %29 = tpu.matmul %27, %28, %cst_13 {dimension_numbers = #tpu.dot_dimension_numbers<[1], [0], [0], [1], [0, 0, 1, 1], [], []>} : vector<40x16xf32>, vector<16x16xf32>, vector<40x16xf32> -> vector<40x16xf32>
    %c0_14 = arith.constant 0 : index
    %c0_15 = arith.constant 0 : index
    %30 = vector.load %arg6[%c0_14, %c0_15] : memref<1x16xf32, #tpu.memory_space<vmem>>, vector<1x16xf32>
    %31 = vector.broadcast %30 : vector<1x16xf32> to vector<40x16xf32>
    %32 = arith.addf %29, %31 : vector<40x16xf32>
    %33 = vector.shape_cast %32 : vector<40x16xf32> to vector<5x8x16xf32>
    %c0_16 = arith.constant 0 : index
    %c0_17 = arith.constant 0 : index
    %34 = vector.load %arg9[%c0_16, %c0_17] : memref<80x64xf32, #tpu.memory_space<vmem>>, vector<80x64xf32>
    %35 = vector.shape_cast %34 : vector<80x64xf32> to vector<5x16x64xf32>
    "tpu.trace_start"() <{level = 10 : i32, message = "fbe,feh->fbh"}> : () -> ()
    %cst_18 = arith.constant dense<0.000000e+00> : vector<5x8x64xf32>
    %36 = tpu.matmul %33, %35, %cst_18 {dimension_numbers = #tpu.dot_dimension_numbers<[2], [1], [1], [2], [0, 0, 0, 1, 1, 2], [0], [0]>} : vector<5x8x16xf32>, vector<5x16x64xf32>, vector<5x8x64xf32> -> vector<5x8x64xf32>
    "tpu.trace_stop"() : () -> ()
    %c0_19 = arith.constant 0 : index
    %c0_20 = arith.constant 0 : index
    %37 = vector.load %arg1[%c0_19, %c0_20] : memref<8x80xf32, #tpu.memory_space<vmem>>, vector<8x80xf32>
    %cst_21 = arith.constant dense<0.000000e+00> : vector<8x64xf32>
    %38 = tpu.matmul %37, %34, %cst_21 {dimension_numbers = #tpu.dot_dimension_numbers<[1], [0], [0], [1], [0, 0, 1, 1], [], []>} : vector<8x80xf32>, vector<80x64xf32>, vector<8x64xf32> -> vector<8x64xf32>
    %cst_22 = arith.constant dense<0.000000e+00> : vector<8x64xf32>
    %39 = vector.multi_reduction <add>, %36, %cst_22 [0] : vector<5x8x64xf32> to vector<8x64xf32>
    %40 = arith.addf %38, %39 : vector<8x64xf32>
    %c0_23 = arith.constant 0 : index
    %c0_24 = arith.constant 0 : index
    %41 = vector.load %arg10[%c0_23, %c0_24] : memref<1x64xf32, #tpu.memory_space<vmem>>, vector<1x64xf32>
    %42 = vector.broadcast %41 : vector<1x64xf32> to vector<8x64xf32>
    %43 = arith.addf %40, %42 : vector<8x64xf32>
    %cst_25 = arith.constant 0.000000e+00 : f32
    %44 = vector.broadcast %cst_25 : f32 to vector<8x64xf32>
    %45 = arith.maximumf %43, %44 : vector<8x64xf32>
    %c0_26 = arith.constant 0 : index
    %c0_27 = arith.constant 0 : index
    %46 = vector.load %arg11[%c0_26, %c0_27] : memref<64x32xf32, #tpu.memory_space<vmem>>, vector<64x32xf32>
    %cst_28 = arith.constant dense<0.000000e+00> : vector<8x32xf32>
    %47 = tpu.matmul %45, %46, %cst_28 {dimension_numbers = #tpu.dot_dimension_numbers<[1], [0], [0], [1], [0, 0, 1, 1], [], []>} : vector<8x64xf32>, vector<64x32xf32>, vector<8x32xf32> -> vector<8x32xf32>
    %c0_29 = arith.constant 0 : index
    %c0_30 = arith.constant 0 : index
    %48 = vector.load %arg12[%c0_29, %c0_30] : memref<1x32xf32, #tpu.memory_space<vmem>>, vector<1x32xf32>
    %49 = vector.broadcast %48 : vector<1x32xf32> to vector<8x32xf32>
    %50 = arith.addf %47, %49 : vector<8x32xf32>
    %cst_31 = arith.constant 0.000000e+00 : f32
    %51 = vector.broadcast %cst_31 : f32 to vector<8x32xf32>
    %52 = arith.maximumf %50, %51 : vector<8x32xf32>
    %c0_32 = arith.constant 0 : index
    %c0_33 = arith.constant 0 : index
    %53 = vector.load %arg13[%c0_32, %c0_33] : memref<32x1xf32, #tpu.memory_space<vmem>>, vector<32x1xf32>
    %cst_34 = arith.constant dense<0.000000e+00> : vector<8x1xf32>
    %54 = tpu.matmul %52, %53, %cst_34 {dimension_numbers = #tpu.dot_dimension_numbers<[1], [0], [0], [1], [0, 0, 1, 1], [], []>} : vector<8x32xf32>, vector<32x1xf32>, vector<8x1xf32> -> vector<8x1xf32>
    %c0_35 = arith.constant 0 : index
    %c0_36 = arith.constant 0 : index
    %55 = vector.load %arg14[%c0_35, %c0_36] : memref<1x1xf32, #tpu.memory_space<vmem>>, vector<1x1xf32>
    %56 = vector.broadcast %55 : vector<1x1xf32> to vector<8x1xf32>
    %57 = arith.addf %54, %56 : vector<8x1xf32>
    %c0_37 = arith.constant 0 : index
    %c0_38 = arith.constant 0 : index
    %58 = vector.load %arg2[%c0_37, %c0_38] : memref<8x2xf32, #tpu.memory_space<vmem>>, vector<8x2xf32>
    %c0_39 = arith.constant 0 : index
    %c0_40 = arith.constant 0 : index
    %59 = vector.load %arg7[%c0_39, %c0_40] : memref<1x2xf32, #tpu.memory_space<vmem>>, vector<1x2xf32>
    %60 = vector.broadcast %59 : vector<1x2xf32> to vector<8x2xf32>
    %61 = arith.mulf %58, %60 : vector<8x2xf32>
    %cst_41 = arith.constant dense<0.000000e+00> : vector<8xf32>
    %62 = vector.multi_reduction <add>, %61, %cst_41 [1] : vector<8x2xf32> to vector<8xf32>
    %63 = vector.shape_cast %62 : vector<8xf32> to vector<8x1xf32>
    %c0_42 = arith.constant 0 : index
    %c0_43 = arith.constant 0 : index
    %64 = vector.load %arg8[%c0_42, %c0_43] : memref<1x1xf32, #tpu.memory_space<vmem>>, vector<1x1xf32>
    %65 = vector.broadcast %64 : vector<1x1xf32> to vector<8x1xf32>
    %66 = arith.addf %63, %65 : vector<8x1xf32>
    %67 = arith.addf %66, %57 : vector<8x1xf32>
    %cst_44 = arith.constant 5.000000e-01 : f32
    %68 = vector.broadcast %cst_44 : f32 to vector<8x1xf32>
    %69 = arith.mulf %68, %67 : vector<8x1xf32>
    %cst_45 = arith.constant 0.000000e+00 : f32
    %70 = vector.broadcast %cst_45 : f32 to vector<8x1xf32>
    %71 = arith.subf %70, %69 : vector<8x1xf32>
    %72 = math.exp %71 : vector<8x1xf32>
    %cst_46 = arith.constant 1.000000e+00 : f32
    %73 = vector.broadcast %cst_46 : f32 to vector<8x1xf32>
    %74 = arith.addf %73, %72 : vector<8x1xf32>
    %cst_47 = arith.constant 1.000000e+00 : f32
    %75 = vector.broadcast %cst_47 : f32 to vector<8x1xf32>
    %76 = arith.divf %75, %74 : vector<8x1xf32>
    %c0_48 = arith.constant 0 : index
    %c0_49 = arith.constant 0 : index
    %77 = vector.load %arg15[%c0_48, %c0_49] : memref<8x1xf32, #tpu.memory_space<vmem>>, vector<8x1xf32>
    tpu.vector_store %arg15[%c0_48, %c0_49], %76 {strides = array<i32>} : memref<8x1xf32, #tpu.memory_space<vmem>>, vector<8x1xf32>,
    return
  }
}

</mosaic_0001>

<bundles_post_ra>
// kernel: tpu_custom_call.1
= control target key start
LH: loop header
LB: loop body
LE: loop exit
PB: predicated region body
PF: predicated region fallthrough
CT: control target
= control target key end

     0   :  { %v2167_v0 = vmov 0.0|0.0   ;;  %vm2168_vm0 = vmmov 0   ;;  %v2169_v3 = vmov 0.0   ;;  %vm68_vm1 = vcmask 130048   ;;  %s2170_s18 = smov 112   ;;  %s2531_s3 = inlined_call_operand.vmem [shape: f32[16,48], index: 3, kind: input, shape index: {}]   ;;  %s2532_s0 = inlined_call_operand.vmem [shape: f32[5,8,16], index: 0, kind: input, shape index: {}]   ;;  %s2533_s4 = inlined_call_operand.vmem [shape: f32[1,48], index: 4, kind: input, shape index: {}]   ;;  %s2534_s5 = inlined_call_operand.vmem [shape: f32[16,16], index: 5, kind: input, shape index: {}]   ;;  %s2535_s9 = inlined_call_operand.vmem [shape: f32[80,64], index: 9, kind: input, shape index: {}]   ;;  %s2536_s1 = inlined_call_operand.vmem [shape: f32[8,80], index: 1, kind: input, shape index: {}]   ;;  %s2537_s6 = inlined_call_operand.vmem [shape: f32[1,16], index: 6, kind: input, shape index: {}]   ;;  %s2538_s11 = inlined_call_operand.vmem [shape: f32[64,32], index: 11, kind: input, shape index: {}]   ;;  %s2539_s13 = inlined_call_operand.vmem [shape: f32[32,1], index: 13, kind: input, shape index: {}]   ;;  %s2540_s10 = inlined_call_operand.vmem [shape: f32[1,64], index: 10, kind: input, shape index: {}]   ;;  %s2541_s2 = inlined_call_operand.vmem [shape: f32[8,2], index: 2, kind: input, shape index: {}]   ;;  %s2542_s7 = inlined_call_operand.vmem [shape: f32[1,2], index: 7, kind: input, shape index: {}]   ;;  %s2543_s8 = inlined_call_operand.<no memory space> [shape: f32[1,1], index: 8, kind: input, shape index: {}]   ;;  %s2544_s14 = inlined_call_operand.<no memory space> [shape: f32[1,1], index: 14, kind: input, shape index: {}]   ;;  %s2545_s12 = inlined_call_operand.vmem [shape: f32[1,32], index: 12, kind: input, shape index: {}]   ;;  %s2546_s15 = inlined_call_operand.vmem [shape: f32[8,1], index: 15, kind: output, shape index: {}]  }
   0x1   :  { %2082 = vmatprep.subr.bf16.mxu0 %v2167_v0  ;;  %v59_v1 = vld [vmem:[%s2531_s3] sm:$0xff]  ;;  %v60_v2 = vld [vmem:[%s2531_s3 + $0x8] sm:$0xff]  ;;  %1910 = vmatprep.mubr.msk.f32.mxu0 %vm2168_vm0, %v2169_v3  ;;  %v56_v8 = vld [vmem:[%s2532_s0 + $0x10] sm:$0xff]  ;;  %vm564_vm2 = vcmask 64512   ;;  %vm1500_vm3 = vcmask 654336   ;;  %vm1490_vm4 = vcmask 523264  }
   0x2   :  { %v2083_v4 = vpack.c.bf16 %v60_v2, %v59_v1  ;;  %2136 = vmatprep.subr.bf16.mxu1 %v2167_v0  ;;  %1922 = vmatprep.mubr.msk.f32.mxu1 %vm2168_vm0, %v2169_v3  ;;  %v54_v5 = vld [vmem:[%s2532_s0] sm:$0xff]  ;;  %v55_v7 = vld [vmem:[%s2532_s0 + $0x8] sm:$0xff]  ;;  %v57_v9 = vld [vmem:[%s2532_s0 + $0x18] sm:$0xff]  ;;  %vm1766_vm5 = vcmask 15360   ;;  %vm1683_vm6 = vcmask 261120   ;;  %vm1786_vm7 = vcmask 7168  }
   0x3   :  { %v58_v6 = vld [vmem:[%s2532_s0 + $0x20] sm:$0xff]  ;;  %s2171_s0 = smov 96  }
   0x4   :  { %2084 = vmatpush3.bf16.msra.mxu0 %v2083_v4  ;;  %2137 = vmatpush3.bf16.msra.mxu1 %v2083_v4  ;;  %v1792_v10 = vld [vmem:[%s2533_s4] ss:$0 sm:$0xff] }
   0x5   :  { %1925 = vmatprep.subr.mxu1 %v2169_v3  ;;  %1950 = vmatprep.subr.mxu0 %v2169_v3 }
   0x7   :  { %1911 = vmatmul.mubr.msk.f32.vlgmr.msra.gmra.mrb[0].mxu0 %vm68_vm1, %v54_v5  ;;  %1923 = vmatmul.mubr.msk.f32.vlgmr.msra.gmra.mrb[0].mxu1 %vm68_vm1, %v58_v6 }
   0x8   :  { %1913 = vmatprep.mubr.msk.f32.mxu0 %vm2168_vm0, %v2169_v3  ;;  %1927 = vmatprep.mubr.msk.f32.mxu1 %vm2168_vm0, %v2169_v3 }
   0xb   :  { %1914 = vmatmul.mubr.msk.f32.gmra.mrb[2].mxu0 %vm68_vm1, %v55_v7 }
   0xc   :  { %1916 = vmatprep.mubr.msk.f32.mxu0 %vm2168_vm0, %v2169_v3 }
   0xf   :  { %1917 = vmatmul.mubr.msk.f32.gmra.mrb[4].mxu0 %vm68_vm1, %v56_v8 }
  0x10   :  { %1919 = vmatprep.mubr.msk.f32.mxu0 %vm2168_vm0, %v2169_v3 }
  0x13   :  { %1920 = vmatmul.mubr.msk.f32.gmra.mrb[6].mxu0 %vm68_vm1, %v57_v9 }
  0x14   :  { %1952 = vmatprep.mubr.msk.f32.mxu0 %vm2168_vm0, %v2169_v3 }
  0xda   :  { %v150_v11 = vpop.f32.mrb[0].mxu0  ;;  %v170_v12 = vpop.f32.mrb[0].mxu1 }
  0xdb   :  { %v2299_v13 = vadd.f32 %v1792_v10, %v150_v11  ;;  %v1912_v14 = vpop.f32.mrb[1].mxu0  ;;  %v1924_v15 = vpop.f32.mrb[1].mxu1  ;;  %v2305_v19 = vadd.f32 %v1792_v10, %v170_v12 }
  0xdd   :  { %175 = vrot.lane.b32.xlu0 %v2299_v13, %s2170_s18 }
  0xde   :  { %v155_v16 = vpop.f32.mrb[2].mxu0 }
  0xdf   :  { %v2302_v17 = vadd.f32 %v1792_v10, %v155_v16  ;;  %v1915_v18 = vpop.f32.mrb[3].mxu0 }
  0xe1   :  { %252 = vrot.lane.b32.xlu0 %v2302_v17, %s2170_s18 }
  0xe2   :  { %v160_v20 = vpop.f32.mrb[4].mxu0 }
  0xe3   :  { %v161_v21 = vadd.f32 %v1792_v10, %v160_v20  ;;  %v1918_v22 = vpop.f32.mrb[5].mxu0 }
  0xe5   :  { %329 = vrot.lane.b32.xlu1 %v161_v21, %s2170_s18  ;;  %483 = vrot.lane.b32.xlu0 %v2305_v19, %s2170_s18 }
  0xe6   :  { %v165_v23 = vpop.f32.mrb[6].mxu0 }
  0xe7   :  { %v2308_v24 = vadd.f32 %v1792_v10, %v165_v23  ;;  %v1921_v25 = vpop.f32.mrb[7].mxu0 }
  0xe9   :  { %406 = vrot.lane.b32.xlu1 %v2308_v24, %s2170_s18 }
 0x14f   :  { %v176_v26 = vpop.permute.xlu0 %175 }
 0x150   :  { %1926 = vmatpush3.xpose.msk.msra.mxu1 %vm68_vm1, %v176_v26 }
 0x151   :  { %1930 = vmatprep.subr.mxu1 %v2169_v3 }
 0x153   :  { %1928 = vmatmul.mubr.msk.f32.vlgmr.msra.gmra.mrb[2].mxu1 %vm68_vm1, %v2299_v13  ;;  %v253_v27 = vpop.permute.xlu0 %252 }
 0x154   :  { %1931 = vmatpush3.xpose.msk.msra.mxu1 %vm68_vm1, %v253_v27  ;;  %1932 = vmatprep.mubr.msk.f32.mxu1 %vm2168_vm0, %v2169_v3 }
 0x155   :  { %1935 = vmatprep.subr.mxu1 %v2169_v3 }
 0x157   :  { %1933 = vmatmul.mubr.msk.f32.vlgmr.msra.gmra.mrb[4].mxu1 %vm68_vm1, %v2302_v17  ;;  %v330_v28 = vpop.permute.xlu1 %329  ;;  %v484_v30 = vpop.permute.xlu0 %483 }
 0x158   :  { %1936 = vmatpush3.xpose.msk.msra.mxu1 %vm68_vm1, %v330_v28  ;;  %1937 = vmatprep.mubr.msk.f32.mxu1 %vm2168_vm0, %v2169_v3 }
 0x159   :  { %1940 = vmatprep.subr.mxu1 %v2169_v3 }
 0x15b   :  { %1938 = vmatmul.mubr.msk.f32.vlgmr.msra.gmra.mrb[6].mxu1 %vm68_vm1, %v161_v21  ;;  %v407_v29 = vpop.permute.xlu1 %406 }
 0x15c   :  { %1941 = vmatpush3.xpose.msk.msra.mxu1 %vm68_vm1, %v407_v29  ;;  %1942 = vmatprep.mubr.msk.f32.mxu1 %vm2168_vm0, %v2169_v3 }
 0x15d   :  { %1945 = vmatprep.subr.mxu1 %v2169_v3 }
 0x15f   :  { %1943 = vmatmul.mubr.msk.f32.vlgmr.msra.gmra.mrb[8].mxu1 %vm68_vm1, %v2308_v24 }
 0x160   :  { %1946 = vmatpush3.xpose.msk.msra.mxu1 %vm68_vm1, %v484_v30  ;;  %1947 = vmatprep.mubr.msk.f32.mxu1 %vm2168_vm0, %v2169_v3  ;;  %v1000_v30 = vld [vmem:[%s2534_s5] sm:$0xff] }
 0x161   :  { %1955 = vmatprep.subr.mxu1 %v2169_v3 }
 0x163   :  { %1948 = vmatmul.mubr.msk.f32.vlgmr.msra.gmra.mrb[10].mxu1 %vm68_vm1, %v2305_v19 }
 0x164   :  { %1957 = vmatprep.mubr.msk.f32.mxu1 %vm2168_vm0, %v2169_v3 }
 0x226   :  { %v247_v31 = vpop.f32.mrb[2].mxu1 }
 0x227   :  { %v559_v32 = vmul.f32 0.25, %v247_v31  ;;  %v1929_v33 = vpop.f32.mrb[3].mxu1  ;;  %v1001_v31 = vld [vmem:[%s2534_s5 + $0x8] sm:$0xff] }
 0x228   :  { %v2086_v33 = vpack.c.bf16 %v1001_v31, %v1000_v30  ;;  %v1672_v30 = vld [vmem:[%s2539_s13] sm:$0xff]  ;;  %v1673_v31 = vld [vmem:[%s2539_s13 + $0x8] sm:$0xff] }
 0x229   :  { %v565_v34 = vsel %vm564_vm2, %v559_v32, -inf }
 0x22a   :  { %v324_v35 = vpop.f32.mrb[4].mxu1  ;;  %566 = vmax.xlane.f32.xlu1 %v565_v34 }
 0x22b   :  { %v560_v36 = vmul.f32 0.25, %v324_v35  ;;  %v1934_v37 = vpop.f32.mrb[5].mxu1 }
 0x22d   :  { %v568_v38 = vsel %vm564_vm2, %v560_v36, -inf }
 0x22e   :  { %569 = vmax.xlane.f32.xlu0 %v568_v38  ;;  %v401_v39 = vpop.f32.mrb[6].mxu1 }
 0x22f   :  { %v561_v40 = vmul.f32 0.25, %v401_v39  ;;  %v1939_v41 = vpop.f32.mrb[7].mxu1 }
 0x231   :  { %v571_v42 = vsel %vm564_vm2, %v561_v40, -inf }
 0x232   :  { %572 = vmax.xlane.f32.xlu0 %v571_v42  ;;  %v478_v43 = vpop.f32.mrb[8].mxu1 }
 0x233   :  { %v562_v44 = vmul.f32 0.25, %v478_v43  ;;  %v1944_v45 = vpop.f32.mrb[9].mxu1 }
 0x235   :  { %v574_v46 = vsel %vm564_vm2, %v562_v44, -inf }
 0x236   :  { %575 = vmax.xlane.f32.xlu1 %v574_v46  ;;  %v555_v47 = vpop.f32.mrb[10].mxu1 }
 0x237   :  { %v563_v48 = vmul.f32 0.25, %v555_v47  ;;  %v1949_v49 = vpop.f32.mrb[11].mxu1  ;;  %v1114_v47 = vld [vmem:[%s2535_s9] sm:$0xff] }
 0x239   :  { %v577_v50 = vsel %vm564_vm2, %v563_v48, -inf }
 0x23a   :  { %578 = vmax.xlane.f32.xlu0 %v577_v50  ;;  %v1116_v50 = vld [vmem:[%s2535_s9 + $0x10] sm:$0xff] }
 0x247   :  { %696 = vrot.lane.b32.xlu1 %v2302_v17, %s2171_s0 }
 0x24b   :  { %772 = vrot.lane.b32.xlu1 %v161_v21, %s2171_s0 }
 0x250   :  { %620 = vrot.lane.b32.xlu0 %v2299_v13, %s2171_s0 }
 0x2b7   :  { %v567_v51 = vpop.xlane.xlu1 %566 }
 0x2b8   :  { %v580_v52 = vsub.f32 %v559_v32, %v567_v51  ;;  %v1117_v51 = vld [vmem:[%s2535_s9 + $0x18] sm:$0xff] }
 0x2ba   :  { %v585_v53 = vmul.f32 1.442695, %v580_v52  ;;  %v2092_v52 = vpack.c.bf16 %v1117_v51, %v1116_v50  ;;  %v1825_v51 = vld [vmem:[%s2540_s10] ss:$0 sm:$0xff] }
 0x2bb   :  { %v570_v54 = vpop.xlane.xlu0 %569 }
 0x2bc   :  { %2143 = vpow2.f32 %v585_v53  ;;  %v581_v55 = vsub.f32 %v560_v36, %v570_v54  ;;  %v1118_v53 = vld [vmem:[%s2535_s9 + $0x20] sm:$0xff]  ;;  %v1119_v54 = vld [vmem:[%s2535_s9 + $0x28] sm:$0xff] }
 0x2be   :  { %v587_v56 = vmul.f32 1.442695, %v581_v55  ;;  %v2095_v55 = vpack.c.bf16 %v1119_v54, %v1118_v53 }
 0x2bf   :  { %v573_v57 = vpop.xlane.xlu0 %572 }
 0x2c0   :  { %2145 = vpow2.f32 %v587_v56  ;;  %v582_v58 = vsub.f32 %v561_v40, %v573_v57  ;;  %v1120_v56 = vld [vmem:[%s2535_s9 + $0x30] sm:$0xff]  ;;  %v1121_v57 = vld [vmem:[%s2535_s9 + $0x38] sm:$0xff] }
 0x2c2   :  { %v589_v59 = vmul.f32 1.442695, %v582_v58  ;;  %v2098_v58 = vpack.c.bf16 %v1121_v57, %v1120_v56  ;;  %v1675_v56 = vld [vmem:[%s2539_s13 + $0x18] sm:$0xff] }
 0x2c3   :  { %v576_v60 = vpop.xlane.xlu1 %575 }
 0x2c4   :  { %2147 = vpow2.f32 %v589_v59  ;;  %v583_v61 = vsub.f32 %v562_v44, %v576_v60  ;;  %v1122_v59 = vld [vmem:[%s2535_s9 + $0x40] sm:$0xff]  ;;  %v1123_v60 = vld [vmem:[%s2535_s9 + $0x48] sm:$0xff] }
 0x2c6   :  { %v2144_v62 = vpop.eup %2143  ;;  %v591_v63 = vmul.f32 1.442695, %v583_v61  ;;  %v2101_v61 = vpack.c.bf16 %v1123_v60, %v1122_v59  ;;  %v1830_v59 = vld [vmem:[%s2542_s7] ss:$0 sm:$0xff]  ;;  %v20_v60 = vstv %s2543_s8 }
 0x2c7   :  { %v579_v1 = vpop.xlane.xlu0 %578  ;;  %v697_v2 = vpop.permute.xlu1 %696  ;;  %v595_v4 = vsel %vm564_vm2, %v2144_v62, 0.0  ;;  %21 = vst [vmem:[#allocation2] sm:$0x1] %v20_v60 }
 0x2c8   :  { %2149 = vpow2.f32 %v591_v63  ;;  %v584_v5 = vsub.f32 %v563_v48, %v579_v1  ;;  %596 = vadd.xlane.f32.xlu1 %v595_v4  ;;  %1956 = vmatpush3.msra.mxu1 %v697_v2  ;;  %v1115_v48 = vld [vmem:[%s2535_s9 + $0x8] sm:$0xff]  ;;  %v1813_v63 = vld [vmem:[%s2537_s6] ss:$0 sm:$0xff] }
 0x2c9   :  { %1965 = vmatprep.subr.mxu1 %v2169_v3  ;;  %v2089_v49 = vpack.c.bf16 %v1115_v48, %v1114_v47 }
 0x2ca   :  { %v2146_v6 = vpop.eup %2145  ;;  %v593_v7 = vmul.f32 1.442695, %v584_v5 }
 0x2cb   :  { %v621_v8 = vpop.permute.xlu0 %620  ;;  %v598_v9 = vsel %vm564_vm2, %v2146_v6, 0.0  ;;  %v773_v16 = vpop.permute.xlu1 %772 }
 0x2cc   :  { %2151 = vpow2.f32 %v593_v7  ;;  %599 = vadd.xlane.f32.xlu0 %v598_v9  ;;  %1951 = vmatpush3.msra.mxu0 %v621_v8 }
 0x2cd   :  { %1960 = vmatprep.subr.mxu0 %v2169_v3 }
 0x2ce   :  { %v2148_v10 = vpop.eup %2147 }
 0x2cf   :  { %v601_v11 = vsel %vm564_vm2, %v2148_v10, 0.0 }
 0x2d0   :  { %602 = vadd.xlane.f32.xlu1 %v601_v11 }
 0x2d2   :  { %v2150_v12 = vpop.eup %2149 }
 0x2d3   :  { %v604_v13 = vsel %vm564_vm2, %v2150_v12, 0.0 }
 0x2d4   :  { %605 = vadd.xlane.f32.xlu0 %v604_v13 }
 0x2d6   :  { %v2152_v14 = vpop.eup %2151 }
 0x2d7   :  { %v607_v15 = vsel %vm564_vm2, %v2152_v14, 0.0 }
 0x2d8   :  { %608 = vadd.xlane.f32.xlu1 %v607_v15 }
 0x2e9   :  { %924 = vrot.lane.b32.xlu1 %v2305_v19, %s2171_s0 }
 0x2ea   :  { %848 = vrot.lane.b32.xlu0 %v2308_v24, %s2171_s0 }
 0x355   :  { %v597_v17 = vpop.xlane.xlu1 %596 }
 0x356   :  { %2153 = vrcp.f32 %v597_v17  ;;  %v1583_v17 = vld [vmem:[%s2538_s11] sm:$0xff] }
 0x359   :  { %v600_v18 = vpop.xlane.xlu0 %599 }
 0x35a   :  { %2155 = vrcp.f32 %v600_v18  ;;  %v1584_v18 = vld [vmem:[%s2538_s11 + $0x8] sm:$0xff] }
 0x35d   :  { %v603_v20 = vpop.xlane.xlu1 %602 }
 0x35e   :  { %2157 = vrcp.f32 %v603_v20  ;;  %v2119_v20 = vpack.c.bf16 %v1584_v18, %v1583_v17 }
 0x360   :  { %v2154_v21 = vpop.eup %2153 }
 0x361   :  { %v615_v22 = vmul.f32 %v2154_v21, %v2144_v62  ;;  %v606_v23 = vpop.xlane.xlu0 %605  ;;  %v1489_v62 = vld [vmem:[%s2536_s1] sm:$0xff]  ;;  %v1585_v21 = vld [vmem:[%s2538_s11 + $0x10] sm:$0xff] }
 0x362   :  { %2159 = vrcp.f32 %v606_v23  ;;  %v1587_v23 = vld [vmem:[%s2538_s11 + $0x20] sm:$0xff] }
 0x363   :  { %1953 = vmatmul.mubr.msk.f32.vlgmr.msra.gmra.mrb[8].mxu0 %vm564_vm2, %v615_v22 }
 0x364   :  { %v2156_v25 = vpop.eup %2155  ;;  %1961 = vmatpush3.msra.mxu0 %v773_v16  ;;  %1962 = vmatprep.mubr.msk.f32.mxu0 %vm2168_vm0, %v2169_v3 }
 0x365   :  { %v616_v19 = vmul.f32 %v2156_v25, %v2146_v6  ;;  %v849_v24 = vpop.permute.xlu0 %848  ;;  %v609_v26 = vpop.xlane.xlu1 %608  ;;  %1970 = vmatprep.subr.mxu0 %v2169_v3  ;;  %v1588_v25 = vld [vmem:[%s2538_s11 + $0x28] sm:$0xff] }
 0x366   :  { %2161 = vrcp.f32 %v609_v26 }
 0x367   :  { %1958 = vmatmul.mubr.msk.f32.vlgmr.msra.gmra.mrb[12].mxu1 %vm564_vm2, %v616_v19 }
 0x368   :  { %v2158_v27 = vpop.eup %2157  ;;  %1966 = vmatpush3.msra.mxu1 %v849_v24  ;;  %1967 = vmatprep.mubr.msk.f32.mxu1 %vm2168_vm0, %v2169_v3  ;;  %v2125_v24 = vpack.c.bf16 %v1588_v25, %v1587_v23 }
 0x369   :  { %v617_v28 = vmul.f32 %v2158_v27, %v2148_v10  ;;  %v925_v29 = vpop.permute.xlu1 %924  ;;  %2085 = vmatprep.subr.bf16.mxu1 %v2167_v0  ;;  %v1589_v27 = vld [vmem:[%s2538_s11 + $0x30] sm:$0xff] }
 0x36b   :  { %1963 = vmatmul.mubr.msk.f32.vlgmr.msra.gmra.mrb[10].mxu0 %vm564_vm2, %v617_v28  ;;  %v1590_v28 = vld [vmem:[%s2538_s11 + $0x38] sm:$0xff] }
 0x36c   :  { %v2160_v32 = vpop.eup %2159  ;;  %1971 = vmatpush3.msra.mxu0 %v925_v29  ;;  %1972 = vmatprep.mubr.msk.f32.mxu0 %vm2168_vm0, %v2169_v3  ;;  %v2128_v29 = vpack.c.bf16 %v1590_v28, %v1589_v27 }
 0x36d   :  { %v618_v34 = vmul.f32 %v2160_v32, %v2150_v12  ;;  %2088 = vmatprep.subr.bf16.mxu0 %v2167_v0  ;;  %v2131_v32 = vpack.c.bf16 %v1673_v31, %v1672_v30 }
 0x36f   :  { %1968 = vmatmul.mubr.msk.f32.vlgmr.msra.gmra.mrb[14].mxu1 %vm564_vm2, %v618_v34 }
 0x370   :  { %v2162_v35 = vpop.eup %2161  ;;  %2087 = vmatpush3.bf16.msra.mxu1 %v2086_v33  ;;  %1979 = vmatprep.mubr.msk.f32.mxu1 %vm2168_vm0, %v2169_v3 }
 0x371   :  { %v619_v36 = vmul.f32 %v2162_v35, %v2152_v14  ;;  %2103 = vmatprep.subr.bf16.mxu1 %v2167_v0 }
 0x373   :  { %1973 = vmatmul.mubr.msk.f32.vlgmr.msra.gmra.mrb[12].mxu0 %vm564_vm2, %v619_v36 }
 0x374   :  { %1998 = vmatprep.mubr.msk.f32.mxu0 %vm2168_vm0, %v2169_v3  ;;  %2090 = vmatpush3.bf16.msra.mxu0 %v2089_v49 }
 0x375   :  { %2091 = vmatprep.subr.bf16.mxu0 %v2167_v0 }
 0x436   :  { %v692_v37 = vpop.f32.mrb[8].mxu0 }
 0x437   :  { %v1954_v38 = vpop.f32.mrb[9].mxu0  ;;  %1980 = vmatmul.mubr.msk.f32.vlgmr.msra.gmra.mrb[16].mxu1 %vm68_vm1, %v692_v37 }
 0x438   :  { %1982 = vmatprep.mubr.msk.f32.mxu1 %vm2168_vm0, %v2169_v3  ;;  %2105 = vmatpush3.bf16.msra.mxu1 %v2089_v49 }
 0x439   :  { %2106 = vmatprep.subr.bf16.mxu1 %v2167_v0 }
 0x43a   :  { %v768_v39 = vpop.f32.mrb[12].mxu1 }
 0x43b   :  { %v1959_v40 = vpop.f32.mrb[13].mxu1  ;;  %1983 = vmatmul.mubr.msk.f32.gmra.mrb[18].mxu1 %vm68_vm1, %v768_v39 }
 0x43c   :  { %1985 = vmatprep.mubr.msk.f32.mxu1 %vm2168_vm0, %v2169_v3  ;;  %2108 = vmatpush3.bf16.msra.mxu1 %v2092_v52 }
 0x43d   :  { %2109 = vmatprep.subr.bf16.mxu1 %v2167_v0 }
 0x43e   :  { %v844_v41 = vpop.f32.mrb[10].mxu0 }
 0x43f   :  { %v1964_v42 = vpop.f32.mrb[11].mxu0  ;;  %1986 = vmatmul.mubr.msk.f32.gmra.mrb[20].mxu1 %vm68_vm1, %v844_v41 }
 0x440   :  { %1988 = vmatprep.mubr.msk.f32.mxu1 %vm2168_vm0, %v2169_v3  ;;  %2111 = vmatpush3.bf16.msra.mxu1 %v2095_v55 }
 0x441   :  { %2112 = vmatprep.subr.bf16.mxu1 %v2167_v0 }
 0x442   :  { %v920_v43 = vpop.f32.mrb[14].mxu1 }
 0x443   :  { %v1969_v44 = vpop.f32.mrb[15].mxu1  ;;  %1989 = vmatmul.mubr.msk.f32.gmra.mrb[22].mxu1 %vm68_vm1, %v920_v43 }
 0x444   :  { %1991 = vmatprep.mubr.msk.f32.mxu1 %vm2168_vm0, %v2169_v3  ;;  %2114 = vmatpush3.bf16.msra.mxu1 %v2098_v58 }
 0x445   :  { %2115 = vmatprep.subr.bf16.mxu1 %v2167_v0 }
 0x446   :  { %v996_v45 = vpop.f32.mrb[12].mxu0 }
 0x447   :  { %v1974_v46 = vpop.f32.mrb[13].mxu0  ;;  %1992 = vmatmul.mubr.msk.f32.gmra.mrb[24].mxu1 %vm68_vm1, %v996_v45 }
 0x448   :  { %2049 = vmatprep.mubr.msk.f32.mxu1 %vm2168_vm0, %v2169_v3  ;;  %2117 = vmatpush3.bf16.msra.mxu1 %v2101_v61 }
 0x449   :  { %2130 = vmatprep.subr.bf16.mxu1 %v2167_v0 }
 0x44b   :  { %2050 = vmatmul.mubr.msk.f32.vlgmr.msra.gmra.mrb[26].mxu1 %vm1500_vm3, %v1489_v62 }
 0x44c   :  { %2079 = vmatprep.mubr.msk.f32.mxu1 %vm2168_vm0, %v2169_v3  ;;  %2132 = vmatpush3.bf16.msra.mxu1 %v2131_v32 }
 0x44d   :  { %2133 = vmatprep.subr.bf16.mxu1 %v2167_v0 }
 0x50a   :  { %v1090_v1 = vpop.f32.mrb[16].mxu1 }
 0x50b   :  { %v1091_v2 = vadd.f32 %v1813_v63, %v1090_v1  ;;  %v1981_v4 = vpop.f32.mrb[17].mxu1  ;;  %v1826_v1 = vld [vmem:[%s2545_s12] ss:$0 sm:$0xff] }
 0x50d   :  { %1999 = vmatmul.mubr.msk.f32.vlgmr.msra.gmra.mrb[14].mxu0 %vm68_vm1, %v1091_v2 }
 0x50e   :  { %v1095_v5 = vpop.f32.mrb[18].mxu1  ;;  %2093 = vmatpush3.bf16.msra.mxu0 %v2092_v52  ;;  %2005 = vmatprep.mubr.msk.f32.mxu0 %vm2168_vm0, %v2169_v3 }
 0x50f   :  { %v1096_v6 = vadd.f32 %v1813_v63, %v1095_v5  ;;  %v1984_v7 = vpop.f32.mrb[19].mxu1  ;;  %2094 = vmatprep.subr.bf16.mxu0 %v2167_v0 }
 0x510   :  { %v1831_v7 = vld [vmem:[#allocation2] ss:$0 sm:$0xff] }
 0x511   :  { %2006 = vmatmul.mubr.msk.f32.vlgmr.msra.gmra.mrb[16].mxu0 %vm68_vm1, %v1096_v6 }
 0x512   :  { %v1100_v8 = vpop.f32.mrb[20].mxu1  ;;  %2096 = vmatpush3.bf16.msra.mxu0 %v2095_v55  ;;  %2012 = vmatprep.mubr.msk.f32.mxu0 %vm2168_vm0, %v2169_v3  ;;  %v1674_v55 = vld [vmem:[%s2539_s13 + $0x10] sm:$0xff] }
 0x513   :  { %v1101_v9 = vadd.f32 %v1813_v63, %v1100_v8  ;;  %v1987_v10 = vpop.f32.mrb[21].mxu1  ;;  %2097 = vmatprep.subr.bf16.mxu0 %v2167_v0  ;;  %v2134_v57 = vpack.c.bf16 %v1675_v56, %v1674_v55 }
 0x515   :  { %2013 = vmatmul.mubr.msk.f32.vlgmr.msra.gmra.mrb[18].mxu0 %vm68_vm1, %v1101_v9  ;;  %2135 = vmatpush3.bf16.msra.mxu1 %v2134_v57 }
 0x516   :  { %v1105_v11 = vpop.f32.mrb[22].mxu1  ;;  %2099 = vmatpush3.bf16.msra.mxu0 %v2098_v58  ;;  %2019 = vmatprep.mubr.msk.f32.mxu0 %vm2168_vm0, %v2169_v3  ;;  %v1757_v58 = vld [vmem:[%s2541_s2] sm:$0xff] }
 0x517   :  { %v1106_v12 = vadd.f32 %v1813_v63, %v1105_v11  ;;  %v1990_v13 = vpop.f32.mrb[23].mxu1  ;;  %2100 = vmatprep.subr.bf16.mxu0 %v2167_v0 }
 0x519   :  { %2020 = vmatmul.mubr.msk.f32.vlgmr.msra.gmra.mrb[20].mxu0 %vm68_vm1, %v1106_v12 }
 0x51a   :  { %v1110_v14 = vpop.f32.mrb[24].mxu1  ;;  %2102 = vmatpush3.bf16.msra.mxu0 %v2101_v61  ;;  %2026 = vmatprep.mubr.msk.f32.mxu0 %vm2168_vm0, %v2169_v3  ;;  %v1765_v61 = vmul.f32 %v1830_v59, %v1757_v58 }
 0x51b   :  { %v1111_v15 = vadd.f32 %v1813_v63, %v1110_v14  ;;  %v1993_v16 = vpop.f32.mrb[25].mxu1  ;;  %2118 = vmatprep.subr.bf16.mxu0 %v2167_v0  ;;  %v22_v63 = vstv %s2544_s14 }
 0x51c   :  { %v1767_v62 = vsel %vm1766_vm5, %v1765_v61, 0.0  ;;  %23 = vst [vmem:[#allocation3] sm:$0x1] %v22_v63 }
 0x51d   :  { %2027 = vmatmul.mubr.msk.f32.vlgmr.msra.gmra.mrb[22].mxu0 %vm68_vm1, %v1111_v15  ;;  %1768 = vadd.xlane.f32.xlu0 %v1767_v62 }
 0x51e   :  { %2068 = vmatprep.mubr.msk.f32.mxu0 %vm2168_vm0, %v2169_v3  ;;  %2120 = vmatpush3.bf16.msra.mxu0 %v2119_v20  ;;  %v1586_v3 = vld [vmem:[%s2538_s11 + $0x18] sm:$0xff]  ;;  %v1570_v19 = vpop.f32.mrb[26].mxu1 }
 0x51f   :  { %2121 = vmatprep.subr.bf16.mxu0 %v2167_v0  ;;  %v2122_v22 = vpack.c.bf16 %v1586_v3, %v1585_v21  ;;  %v2051_v26 = vpop.f32.mrb[27].mxu1 }
 0x522   :  { %2123 = vmatpush3.bf16.msra.mxu0 %v2122_v22 }
 0x523   :  { %2124 = vmatprep.subr.bf16.mxu0 %v2167_v0  ;;  %v1828_v9 = vld [vmem:[#allocation3] ss:$0 sm:$0xff] }
 0x526   :  { %2126 = vmatpush3.bf16.msra.mxu0 %v2125_v24 }
 0x527   :  { %2127 = vmatprep.subr.bf16.mxu0 %v2167_v0 }
 0x52a   :  { %2129 = vmatpush3.bf16.msra.mxu0 %v2128_v29 }
 0x5aa   :  { %v1769_v8 = vpop.xlane.xlu0 %1768 }
 0x5ab   :  { %v1777_v10 = vadd.f32 %v1831_v7, %v1769_v8 }
 0x5e0   :  { %v1193_v33 = vpop.f32.mrb[14].mxu0 }
 0x5e1   :  { %v2000_v34 = vpop.f32.mrb[15].mxu0  ;;  %v1491_v36 = vsel %vm1490_vm4, %v1193_v33, 0.0 }
 0x5e4   :  { %v1266_v35 = vpop.f32.mrb[16].mxu0 }
 0x5e5   :  { %v1492_v37 = vsel %vm1490_vm4, %v1266_v35, 0.0  ;;  %v2007_v38 = vpop.f32.mrb[17].mxu0 }
 0x5e6   :  { %v1493_v39 = vadd.f32 %v1492_v37, %v1491_v36 }
 0x5e8   :  { %v1339_v40 = vpop.f32.mrb[18].mxu0 }
 0x5e9   :  { %v1494_v41 = vsel %vm1490_vm4, %v1339_v40, 0.0  ;;  %v2014_v42 = vpop.f32.mrb[19].mxu0 }
 0x5ea   :  { %v1495_v43 = vadd.f32 %v1494_v41, %v1493_v39 }
 0x5ec   :  { %v1412_v44 = vpop.f32.mrb[20].mxu0 }
 0x5ed   :  { %v1496_v45 = vsel %vm1490_vm4, %v1412_v44, 0.0  ;;  %v2021_v46 = vpop.f32.mrb[21].mxu0 }
 0x5ee   :  { %v1497_v0 = vadd.f32 %v1496_v45, %v1495_v43 }
 0x5f0   :  { %v1485_v47 = vpop.f32.mrb[22].mxu0 }
 0x5f1   :  { %v1498_v48 = vsel %vm1490_vm4, %v1485_v47, 0.0  ;;  %v2028_v49 = vpop.f32.mrb[23].mxu0 }
 0x5f2   :  { %v1499_v50 = vadd.f32 %v1498_v48, %v1497_v0 }
 0x5f4   :  { %v1571_v52 = vadd.f32 %v1570_v19, %v1499_v50 }
 0x5f6   :  { %v1581_v53 = vadd.f32 %v1825_v51, %v1571_v52 }
 0x5f8   :  { %v1582_v54 = vmax.f32 %v1581_v53, 0.0 }
 0x5fa   :  { %2069 = vmatmul.mubr.msk.f32.vlgmr.msra.gmra.mrb[24].mxu0 %vm1490_vm4, %v1582_v54 }
 0x6cd   :  { %v1667_v2 = vpop.f32.mrb[24].mxu0 }
 0x6ce   :  { %v1668_v4 = vadd.f32 %v1826_v1, %v1667_v2  ;;  %v2070_v5 = vpop.f32.mrb[25].mxu0 }
 0x6d0   :  { %v1671_v6 = vmax.f32 %v1668_v4, 0.0 }
 0x6d2   :  { %2080 = vmatmul.mubr.msk.f32.vlgmr.msra.gmra.mrb[28].mxu1 %vm1683_vm6, %v1671_v6 }
 0x7a5   :  { %v1753_v11 = vpop.f32.mrb[28].mxu1 }
 0x7a6   :  { %v1754_v12 = vadd.f32 %v1828_v9, %v1753_v11  ;;  %v2081_v13 = vpop.f32.mrb[29].mxu1 }
 0x7a8   :  { %v1778_v14 = vadd.f32 %v1777_v10, %v1754_v12 }
 0x7aa   :  { %v1779_v15 = vmul.f32 0.5, %v1778_v14 }
 0x7ac   :  { %v1780_v16 = vsub.f32 0.0, %v1779_v15 }
 0x7ae   :  { %v1781_v17 = vmul.f32 1.442695, %v1780_v16 }
 0x7b0   :  { %2163 = vpow2.f32 %v1781_v17 }
 0x7ba   :  { %v2164_v18 = vpop.eup %2163 }
 0x7bb   :  { %v1783_v20 = vadd.f32 1.0, %v2164_v18 }
 0x7bd   :  { %2165 = vrcp.f32 %v1783_v20 }
 0x7c7   :  { %v2166_v21 = vpop.eup %2165 }
 0x7c8   :  { %1787 = vst.msk [vmem:[%s2546_s15] sm:$0xff] %vm1786_vm7, %v2166_v21 }

</bundles_post_ra>
